<compile_context>
chip_gen: v7x
topology: tpu7x:2x2x1
jax: 0.10.0
libtpu: 0.0.40
codegen_flags: <defaults>
</compile_context>

<pallas_src>
import jax
import jax.numpy as jnp
from jax import lax
from jax.experimental import pallas as pl
from jax.experimental.pallas import tpu as pltpu


def _round_up(a, b):
    return (a + b - 1) // b * b


# ----------------------------- Pallas kernel --------------------------------
def _convt_gemm_kernel(x_ref, w_ref, b_ref, o_ref):
    # x_ref: (Cin, TM) f32   w_ref: (Cin, TN) bf16   b_ref: (1, TN) f32
    # o_ref: (TM, TN) f32
    # Cast x to bf16 on the VPU so the MXU gets native bf16 operands; keep the
    # accumulation in f32.  MXU utilization scales with Cin (the K dim); for
    # small Cin this GEMM is memory-bound, so the store/DMA path dominates.
    x_blk = x_ref[...].astype(jnp.bfloat16)
    acc = lax.dot_general(
        x_blk, w_ref[...],
        dimension_numbers=(((0,), (0,)), ((), ())),   # contract over Cin
        preferred_element_type=jnp.float32)           # (TM, TN) f32 accum
    o_ref[...] = (acc + b_ref[...]).astype(o_ref.dtype)


# --------------------------- module forward ----------------------------------
def up_conv_3d_forward(x, weight, bias, *, tm=512, tn=512):
    """ConvTranspose3d(ch_in, ch_out, kernel_size=2, stride=2) forward.

    x:      (N, C_in, D, H, W)        NCDHW, like PyTorch
    weight: (C_in, C_out, 2, 2, 2)    PyTorch ConvTranspose3d layout
    bias:   (C_out,)
    returns (N, C_out, 2D, 2H, 2W)
    """
    N, Cin, D, H, W = x.shape
    Cout = weight.shape[1]
    S = D * H * W          # spatial rows of the GEMM
    Nout = 8 * Cout        # 8 kernel taps per output channel

    # --- tile sizing (multiples of 128 lanes, clamped for small problems) ---
    tm = max(128, (tm // 128) * 128)
    tn = max(128, (tn // 128) * 128)
    tm = min(tm, _round_up(S, 128))
    # v7x has 2 TensorCores: keep >= ~8 parallel tiles when the volume allows.
    while tm > 128 and N * pl.cdiv(S, tm) < 8:
        tm = max(128, (tm // 2) // 128 * 128)
    S_pad = _round_up(S, tm)
    tn = min(tn, _round_up(Nout, 128))
    Nout_pad = _round_up(Nout, tn)

    # --- operand prep (pure layout plumbing, no compute) ---
    # x: NCDHW -> (N, Cin, S): a free reshape (no HBM transpose pass).
    x3 = x.reshape(N, Cin, S)
    if S_pad != S:
        x3 = jnp.pad(x3, ((0, 0), (0, 0), (0, S_pad - S)))

    # weight (Cin, Cout, 2, 2, 2) -> (Cin, 8*Cout); column = cout*8 + kd*4 + kh*2 + kw.
    w_flat = weight.reshape(Cin, Nout).astype(jnp.bfloat16)
    b_flat = jnp.repeat(bias.astype(jnp.float32), 8).reshape(1, Nout)
    if Nout_pad != Nout:   # zero-pad columns -> lane-dense (128) output stores
        w_flat = jnp.pad(w_flat, ((0, 0), (0, Nout_pad - Nout)))
        b_flat = jnp.pad(b_flat, ((0, 0), (0, Nout_pad - Nout)))

    grid = (N, S_pad // tm, Nout_pad // tn)

    cost = pl.CostEstimate(
        flops=2 * N * S_pad * Cin * Nout_pad,
        transcendentals=0,
        bytes_accessed=(4 * N * Cin * S_pad                         # x (f32)
                        + 2 * Cin * Nout_pad * grid[0] * grid[1]    # w refetch
                        + 4 * N * S_pad * Nout_pad))                # output

    out = pl.pallas_call(
        _convt_gemm_kernel,
        out_shape=jax.ShapeDtypeStruct((N, S_pad, Nout_pad), x.dtype),
        grid_spec=pltpu.PrefetchScalarGridSpec(
            num_scalar_prefetch=0,
            grid=grid,
            in_specs=[
                pl.BlockSpec((None, Cin, tm), lambda n, i, j: (n, 0, i)),
                pl.BlockSpec((Cin, tn),       lambda n, i, j: (0, j)),
                pl.BlockSpec((1, tn),         lambda n, i, j: (0, j)),
            ],
            out_specs=pl.BlockSpec((None, tm, tn), lambda n, i, j: (n, i, j)),
        ),
        compiler_params=pltpu.CompilerParams(
            dimension_semantics=("parallel", "parallel", "parallel"),
            vmem_limit_bytes=48 * 1024 * 1024),
        cost_estimate=cost,
    )(x3, w_flat, b_flat)                              # (N, S_pad, Nout_pad)

    # Slice off padding, then interleave the 8 taps into the 2x upsampled
    # NCDHW volume.  This transpose is required by the NCDHW output contract;
    # a channels-last consumer could replace it with a pure reshape.
    y = out[:, :S, :Nout].reshape(N, D, H, W, Cout, 2, 2, 2)
    y = jnp.transpose(y, (0, 4, 1, 5, 2, 6, 3, 7))     # (N,Cout,D,2,H,2,W,2)
    return y.reshape(N, Cout, 2 * D, 2 * H, 2 * W)


# ------------------------------ reference ------------------------------------
def up_conv_3d_reference(x, weight, bias):
    """Pure-JAX f32 reference for ConvTranspose3d(k=2, s=2)."""
    N, Cin, D, H, W = x.shape
    Cout = weight.shape[1]
    # x (n,c,d,h,w) * W (c,o,kd,kh,kw) -> (n,o,d,kd,h,kh,w,kw)
    y = jnp.einsum("ncdhw,coijk->nodihjwk", x, weight)
    y = y.reshape(N, Cout, 2 * D, 2 * H, 2 * W)
    return y + bias.reshape(1, Cout, 1, 1, 1)


if __name__ == "__main__":
    key = jax.random.PRNGKey(0)
    k_x, k_w, k_b = jax.random.split(key, 3)

    # Small shapes consistent with the module: batch=2, ch_in=4, ch_out=4,
    # spatial 4x4x4 volume -> output (2, 4, 8, 8, 8).
    N, Cin, Cout, D, H, W = 2, 4, 4, 4, 4, 4

    x = jax.random.normal(k_x, (N, Cin, D, H, W), dtype=jnp.float32)
    fan_in = Cout * 2 * 2 * 2
    bound = 1.0 / (fan_in ** 0.5)
    weight = jax.random.uniform(k_w, (Cin, Cout, 2, 2, 2),
                                minval=-bound, maxval=bound, dtype=jnp.float32)
    bias = jax.random.uniform(k_b, (Cout,),
                              minval=-bound, maxval=bound, dtype=jnp.float32)

    y = jax.block_until_ready(jax.jit(up_conv_3d_forward)(x, weight, bias))

    y_ref = up_conv_3d_reference(x, weight, bias)
    assert y.shape == (N, Cout, 2 * D, 2 * H, 2 * W), y.shape
    # bf16 MXU inputs with f32 accumulation -> loosened tolerance vs f32 ref.
    max_err = float(jnp.max(jnp.abs(y - y_ref)))
    assert max_err < 2e-2, max_err

    print("KERNEL_OK")
</pallas_src>

<mosaic_0001>
module attributes {stable_mosaic.version = 11 : i64} {
  func.func @_convt_gemm_kernel(%arg0: i32, %arg1: i32, %arg2: i32, %arg3: memref<1x4x128xf32, #tpu.memory_space<vmem>>, %arg4: memref<4x128xbf16, #tpu.memory_space<vmem>>, %arg5: memref<1x128xf32, #tpu.memory_space<vmem>>, %arg6: memref<1x128x128xf32, #tpu.memory_space<vmem>>) attributes {dimension_semantics = [#tpu.dimension_semantics<parallel>, #tpu.dimension_semantics<parallel>, #tpu.dimension_semantics<parallel>], iteration_bounds = array<i64: 2, 1, 1>, scalar_prefetch = 0 : i64, scratch_operands = 0 : i64, tpu.core_type = #tpu.core_type<tc>, window_params = [{transform_indices = @transform_0, window_bounds = array<i64: 1, 4, 128>}, {transform_indices = @transform_1, window_bounds = array<i64: 4, 128>}, {transform_indices = @transform_2, window_bounds = array<i64: 1, 128>}, {transform_indices = @transform_3, window_bounds = array<i64: 1, 128, 128>}]} {
    %c0 = arith.constant 0 : index
    %c0_0 = arith.constant 0 : index
    %c0_1 = arith.constant 0 : index
    %0 = vector.load %arg3[%c0, %c0_0, %c0_1] : memref<1x4x128xf32, #tpu.memory_space<vmem>>, vector<1x4x128xf32>
    %1 = vector.shape_cast %0 : vector<1x4x128xf32> to vector<4x128xf32>
    %2 = arith.truncf %1 : vector<4x128xf32> to vector<4x128xbf16>
    %c0_2 = arith.constant 0 : index
    %c0_3 = arith.constant 0 : index
    %3 = vector.load %arg4[%c0_2, %c0_3] : memref<4x128xbf16, #tpu.memory_space<vmem>>, vector<4x128xbf16>
    %cst = arith.constant dense<0.000000e+00> : vector<128x128xf32>
    %4 = tpu.matmul %2, %3, %cst {dimension_numbers = #tpu.dot_dimension_numbers<[0], [0], [1], [1], [0, 1, 1, 1], [], []>} : vector<4x128xbf16>, vector<4x128xbf16>, vector<128x128xf32> -> vector<128x128xf32>
    %c0_4 = arith.constant 0 : index
    %c0_5 = arith.constant 0 : index
    %5 = vector.load %arg5[%c0_4, %c0_5] : memref<1x128xf32, #tpu.memory_space<vmem>>, vector<1x128xf32>
    %6 = vector.broadcast %5 : vector<1x128xf32> to vector<128x128xf32>
    %7 = arith.addf %4, %6 : vector<128x128xf32>
    %c0_6 = arith.constant 0 : index
    %c0_7 = arith.constant 0 : index
    %c0_8 = arith.constant 0 : index
    %8 = vector.load %arg6[%c0_6, %c0_7, %c0_8] : memref<1x128x128xf32, #tpu.memory_space<vmem>>, vector<1x128x128xf32>
    %9 = vector.shape_cast %8 : vector<1x128x128xf32> to vector<128x128xf32>
    %10 = vector.shape_cast %7 : vector<128x128xf32> to vector<1x128x128xf32>
    tpu.vector_store %arg6[%c0_6, %c0_7, %c0_8], %10 {strides = array<i32>} : memref<1x128x128xf32, #tpu.memory_space<vmem>>, vector<1x128x128xf32>,
    return
  }
  func.func @transform_0(%arg0: i32, %arg1: i32, %arg2: i32) -> (i32, i32, i32) {
    %c0_i32 = arith.constant 0 : i32
    %c0_i32_0 = arith.constant 0 : i32
    return %arg0, %c0_i32, %arg1 : i32, i32, i32
  }
  func.func @transform_1(%arg0: i32, %arg1: i32, %arg2: i32) -> (i32, i32) {
    %c0_i32 = arith.constant 0 : i32
    %c0_i32_0 = arith.constant 0 : i32
    return %c0_i32, %arg2 : i32, i32
  }
  func.func @transform_2(%arg0: i32, %arg1: i32, %arg2: i32) -> (i32, i32) {
    %c0_i32 = arith.constant 0 : i32
    %c0_i32_0 = arith.constant 0 : i32
    return %c0_i32, %arg2 : i32, i32
  }
  func.func @transform_3(%arg0: i32, %arg1: i32, %arg2: i32) -> (i32, i32, i32) {
    %c0_i32 = arith.constant 0 : i32
    return %arg0, %arg1, %arg2 : i32, i32, i32
  }
}

</mosaic_0001>

<bundles_post_ra>
// kernel: up_conv_3d_forward.1
= control target key start
LH: loop header
LB: loop body
LE: loop exit
PB: predicated region body
PF: predicated region fallthrough
CT: control target
= control target key end

     0   :  { %s663_s12 = smov 0   ;;  %s665_s13 = smov 0   ;;  %s728_s0 = inlined_call_operand.vmem [shape: f32[2,4,128], index: 0, kind: input, shape index: {}]   ;;  %s729_s1 = inlined_call_operand.vmem [shape: bf16[4,128], index: 1, kind: input, shape index: {}]   ;;  %s730_s2 = inlined_call_operand.vmem [shape: f32[1,128], index: 2, kind: input, shape index: {}]   ;;  %s731_s3 = inlined_call_operand.vmem [shape: f32[2,128,128], index: 3, kind: output, shape index: {}]  }
   0x1   :  { %s667_s14 = smov 0  }
   0x2 LB: > { %s32_s15 = sadd.s32 1, %s637_s13  ;;  %p547_p0 = scmp.ge.s32.totalorder %s641_s14, 1  ;;  %s641_s14 = sphi %s667_s14, %s13_s14   ;;  %s637_s13 = sphi %s665_s13, %s733_s13   ;;  %s633_s12 = sphi %s663_s12, %s732_s12  }
   0x3   : > { %p34_p1 = scmp.ge.s32.totalorder %s32_s15, 2  ;;  %p181_p2 = scmp.lt.s32.totalorder %s641_s14, 3 }
   0x5   : > { %s735_s15 = smov (%p34_p1, %s32_s15), 0  ;;  %p182_p3 = pnand %p547_p0, %p181_p2 }
   0x6   : > { %p221_p4 = scmp.lt.s32.totalorder (!%p182_p3), %s633_s12, 1  ;;  %v251_v0 = vld [vmem:[%s729_s1] sm:$0x3] (!%p182_p3)  ;;  %vm300_vm0 = vcmask (!%p182_p3), 1041408   ;;  %vm275_vm1 = vcmask (!%p182_p3), 31744  }
   0x7   : > { %185 = sbr.rel (%p182_p3) target bundleno = 369 (0x171), region = 32  ;;  %592 = vmatprep.subr.msk.bf16.mxu0 (!%p182_p3), %vm300_vm0, %v251_v0  ;;  %v302_v1 = vsel (!%p182_p3), %vm300_vm0, %v251_v0, 0  ;;  %593 = vmatprep.subr.msk.bf16.mxu1 (!%p182_p3), %vm300_vm0, %v251_v0  ;;  %v551_v12 = vld [vmem:[%s730_s2] ss:$0 sm:$0xff] (!%p182_p3) }
   0x8   : > { %573 = vmatpush3.bf16.msra.mxu0 (!%p182_p3), %v302_v1  ;;  %591 = vmatpush3.bf16.msra.mxu1 (!%p182_p3), %v302_v1 }
   0xe   : > { %s737_s12 = smov (!%p221_p4, %s633_s12), 1 }
   0xf   : > { %s548_s18 = sshll.u32 %s737_s12, 2  ;;  %s562_s22 = sshll.u32 %s737_s12, 7 }
  0x10   : > { %s227_s21 = scalar_lea.vmem %s728_s0, %s548_s18  ;;  %s701_s27 = scalar_lea.vmem %s731_s3, %s562_s22 }
  0x11   : > { %v249_v2 = vld [vmem:[%s227_s21] sm:$0xf] }
  0x12   : > { %v250_v3 = vpack.c.bf16 %v249_v2, %v249_v2 }
  0x14   : > { %259 = vxpose.xlu0.c.b16.start.end [1/1] (short) %v250_v3, 128 }
  0x7a   : > { %v267_v4 = vpop.trf.xlu0 }
  0x7b   : > { %574 = vmatprep.mubr.msk.bf16.mxu0 %vm275_vm1, %v267_v4 }
  0x7e   : > { %v268_v5 = vpop.trf.xlu0 }
  0x7f   : > { %575 = vmatmul.mubr.msk.bf16.vlgmr.msra.gmra.mrb[0].mxu0 %vm275_vm1, %v268_v5 }
  0x82   : > { %v269_v6 = vpop.trf.xlu0 }
  0x83   : > { %578 = vmatprep.mubr.msk.bf16.mxu0 %vm275_vm1, %v269_v6 }
  0x86   : > { %v270_v7 = vpop.trf.xlu0 }
  0x87   : > { %579 = vmatmul.mubr.msk.bf16.gmra.mrb[4].mxu0 %vm275_vm1, %v270_v7 }
  0x8a   : > { %v271_v8 = vpop.trf.xlu0 }
  0x8b   : > { %582 = vmatprep.mubr.msk.bf16.mxu1 %vm275_vm1, %v271_v8 }
  0x8e   : > { %v272_v9 = vpop.trf.xlu0 }
  0x8f   : > { %583 = vmatmul.mubr.msk.bf16.vlgmr.msra.gmra.mrb[0].mxu1 %vm275_vm1, %v272_v9 }
  0x92   : > { %v273_v10 = vpop.trf.xlu0 }
  0x93   : > { %586 = vmatprep.mubr.msk.bf16.mxu1 %vm275_vm1, %v273_v10 }
  0x96   : > { %v274_v11 = vpop.trf.xlu0 }
  0x97   : > { %587 = vmatmul.mubr.msk.bf16.gmra.mrb[4].mxu1 %vm275_vm1, %v274_v11 }
 0x152   : > { %v576_v13 = vpop.f32.mrb[0].mxu0 }
 0x153   : > { %v347_v14 = vadd.f32 %v576_v13, %v551_v12  ;;  %v338_v15 = vpop.f32.mrb[1].mxu0 }
 0x154   : > { %v339_v16 = vadd.f32 %v551_v12, %v338_v15  ;;  %v577_v17 = vpop.f32.mrb[2].mxu0 }
 0x155   : > { %403 = vst [vmem:[%s701_s27 + $0x10] sm:$0xff] %v347_v14  ;;  %v350_v18 = vadd.f32 %v577_v17, %v551_v12  ;;  %v341_v19 = vpop.f32.mrb[3].mxu0 }
 0x156   : > { %401 = vst [vmem:[%s701_s27] sm:$0xff] %v339_v16  ;;  %v342_v20 = vadd.f32 %v551_v12, %v341_v19 }
 0x157   : > { %404 = vst [vmem:[%s701_s27 + $0x18] sm:$0xff] %v350_v18 }
 0x158   : > { %402 = vst [vmem:[%s701_s27 + $0x8] sm:$0xff] %v342_v20 }
 0x15a   : > { %v580_v21 = vpop.f32.mrb[4].mxu0 }
 0x15b   : > { %v363_v22 = vadd.f32 %v580_v21, %v551_v12  ;;  %v354_v23 = vpop.f32.mrb[5].mxu0 }
 0x15c   : > { %v355_v24 = vadd.f32 %v551_v12, %v354_v23  ;;  %v581_v25 = vpop.f32.mrb[6].mxu0 }
 0x15d   : > { %407 = vst [vmem:[%s701_s27 + $0x30] sm:$0xff] %v363_v22  ;;  %v366_v26 = vadd.f32 %v581_v25, %v551_v12  ;;  %v357_v27 = vpop.f32.mrb[7].mxu0 }
 0x15e   : > { %405 = vst [vmem:[%s701_s27 + $0x20] sm:$0xff] %v355_v24  ;;  %v358_v28 = vadd.f32 %v551_v12, %v357_v27 }
 0x15f   : > { %408 = vst [vmem:[%s701_s27 + $0x38] sm:$0xff] %v366_v26 }
 0x160   : > { %406 = vst [vmem:[%s701_s27 + $0x28] sm:$0xff] %v358_v28 }
 0x162   : > { %v584_v29 = vpop.f32.mrb[0].mxu1 }
 0x163   : > { %v379_v30 = vadd.f32 %v584_v29, %v551_v12  ;;  %v370_v31 = vpop.f32.mrb[1].mxu1 }
 0x164   : > { %v371_v32 = vadd.f32 %v551_v12, %v370_v31  ;;  %v585_v33 = vpop.f32.mrb[2].mxu1 }
 0x165   : > { %411 = vst [vmem:[%s701_s27 + $0x50] sm:$0xff] %v379_v30  ;;  %v382_v34 = vadd.f32 %v585_v33, %v551_v12  ;;  %v373_v35 = vpop.f32.mrb[3].mxu1 }
 0x166   : > { %409 = vst [vmem:[%s701_s27 + $0x40] sm:$0xff] %v371_v32  ;;  %v374_v36 = vadd.f32 %v551_v12, %v373_v35 }
 0x167   : > { %412 = vst [vmem:[%s701_s27 + $0x58] sm:$0xff] %v382_v34 }
 0x168   : > { %410 = vst [vmem:[%s701_s27 + $0x48] sm:$0xff] %v374_v36 }
 0x16a   : > { %v588_v37 = vpop.f32.mrb[4].mxu1 }
 0x16b   : > { %v395_v38 = vadd.f32 %v588_v37, %v551_v12  ;;  %v386_v39 = vpop.f32.mrb[5].mxu1 }
 0x16c   : > { %v387_v40 = vadd.f32 %v551_v12, %v386_v39  ;;  %v589_v41 = vpop.f32.mrb[6].mxu1 }
 0x16d   : > { %415 = vst [vmem:[%s701_s27 + $0x70] sm:$0xff] %v395_v38  ;;  %v398_v42 = vadd.f32 %v589_v41, %v551_v12  ;;  %v389_v43 = vpop.f32.mrb[7].mxu1 }
 0x16e   : > { %413 = vst [vmem:[%s701_s27 + $0x60] sm:$0xff] %v387_v40  ;;  %v390_v44 = vadd.f32 %v551_v12, %v389_v43 }
 0x16f   : > { %416 = vst [vmem:[%s701_s27 + $0x78] sm:$0xff] %v398_v42 }
 0x170   : > { %414 = vst [vmem:[%s701_s27 + $0x68] sm:$0xff] %v390_v44 }
 0x171 PF: > { %s13_s14 = sadd.s32 1, %s641_s14   ;;  %s732_s12 = smov %s637_s13 }
 0x172   : > { %p10_p5 = scmp.ge.s32.totalorder %s13_s14, 4   ;;  %s733_s13 = smov %s735_s15 }
 0x174   :  { %12 = sbr.rel (!%p10_p5) target bundleno = 2 (0x2), region = 68 }

</bundles_post_ra>
